<compile_context>
chip_gen: v7x
topology: tpu7x:2x2x1
jax: 0.10.0
libtpu: 0.0.40
codegen_flags: <defaults>
</compile_context>

<pallas_src>
import jax
import jax.numpy as jnp
from jax import lax
from jax.experimental import pallas as pl
from jax.experimental.pallas import tpu as pltpu


# ----------------------------- math helpers ---------------------------------

def _expm1_neg(x):
    # exp(x) - 1 for x <= 0 without cancellation near 0, using only
    # Mosaic-supported primitives:  expm1(x) = 2 t / (1 - t), t = tanh(x/2).
    # For x <= 0, (1 - t) is in [1, 2), so the division is well conditioned.
    t = jnp.tanh(0.5 * x)
    return 2.0 * t / (1.0 - t)


def _elu(x):
    # nn.ELU(alpha=1.0)
    return jnp.where(x > 0, x, _expm1_neg(jnp.minimum(x, 0.0)))


def _layernorm(x, g, b):
    # PyTorch nn.LayerNorm: biased variance, eps=1e-5
    m = jnp.mean(x, axis=-1, keepdims=True)
    c = x - m
    v = jnp.mean(c * c, axis=-1, keepdims=True)
    return c * lax.rsqrt(v + 1e-5) * g + b


def _softplus(x):
    # PyTorch F.softplus, threshold=20
    return jnp.where(x > 20.0, x, jnp.log1p(jnp.exp(jnp.minimum(x, 20.0))))


def _mm(a, w):
    return jnp.dot(a, w, preferred_element_type=jnp.float32)


# ------------------------------ Pallas kernel --------------------------------

# rows of the packed (11, W) parameter-vector slab
(_R_B_IN, _R_B_I3, _R_B_H3, _R_G_DET, _R_BE_DET,
 _R_B1, _R_G1, _R_BE1, _R_B_HEAD, _R_G_ST, _R_BE_ST) = range(11)
_VEC_SLAB_KEYS = ("b_in", "b_i3", "b_h3", "g_det", "be_det",
                  "b1", "g1", "be1", "b_head", "g_st", "be_st")


def _make_kernel(S, D, H):
    def kernel(act_ref, eps_ref, stoch0_ref, deter0_ref,
               w_in_a_ref, w_in_s_ref, w_i3_ref, w_h3_ref, w1_ref, w_head_ref,
               vec_ref,
               out_ref,
               stoch_c, deter_c):
        t = pl.program_id(1)

        # (Re)initialize the recurrent carry at the first timestep of each
        # batch block; it then stays resident in VMEM across the T grid steps.
        @pl.when(t == 0)
        def _():
            stoch_c[...] = stoch0_ref[...]
            deter_c[...] = deter0_ref[...]

        def vrow(r, n):
            return vec_ref[r:r + 1, :n]          # (1, n) static slice

        act = act_ref[0]                         # (Bb, A)
        eps = eps_ref[0]                         # (Bb, S)
        stoch = stoch_c[...]                     # (Bb, S)
        h = deter_c[...]                         # (Bb, D)

        # rnn input model: Linear(A+S -> H) + ELU; W_in split by rows so the
        # [action, stoch] concat never leaves the kernel.
        rnn_in = _elu(_mm(act, w_in_a_ref[...]) + _mm(stoch, w_in_s_ref[...])
                      + vrow(_R_B_IN, H))

        # GRUCell(H -> D): gates [r | z | n] packed along lanes -> 2 matmuls.
        gi = _mm(rnn_in, w_i3_ref[...]) + vrow(_R_B_I3, 3 * D)   # (Bb, 3D)
        gh = _mm(h, w_h3_ref[...]) + vrow(_R_B_H3, 3 * D)        # (Bb, 3D)
        r = jax.nn.sigmoid(gi[:, 0:D] + gh[:, 0:D])
        z = jax.nn.sigmoid(gi[:, D:2 * D] + gh[:, D:2 * D])
        n = jnp.tanh(gi[:, 2 * D:3 * D] + r * gh[:, 2 * D:3 * D])
        h_new = (1.0 - z) * n + z * h

        deter = _layernorm(h_new, vrow(_R_G_DET, D), vrow(_R_BE_DET, D))

        # stochastic prior model: Linear + ELU + LayerNorm + Linear(H -> 2S)
        hid = _elu(_mm(deter, w1_ref[...]) + vrow(_R_B1, H))
        hid = _layernorm(hid, vrow(_R_G1, H), vrow(_R_BE1, H))
        head = _mm(hid, w_head_ref[...]) + vrow(_R_B_HEAD, 2 * S)
        mean = head[:, 0:S]
        std = _softplus(head[:, S:2 * S]) + 0.1

        # reparameterized sample + LayerNorm on stoch
        stoch_new = _layernorm(mean + std * eps,
                               vrow(_R_G_ST, S), vrow(_R_BE_ST, S))

        # carry for next timestep
        stoch_c[...] = stoch_new
        deter_c[...] = deter

        # one lane-packed store per step: [mean | std | stoch | deter]
        out_ref[0] = jnp.concatenate([mean, std, stoch_new, deter], axis=-1)

    return kernel


# ------------------------------- wrappers -------------------------------------

def _pack_vec_slab(params, width):
    rows = []
    for k in _VEC_SLAB_KEYS:
        r = params[k].reshape(-1).astype(jnp.float32)
        rows.append(jnp.pad(r, (0, width - r.shape[0])))
    return jnp.stack(rows, axis=0)


def rssm_rollout(actions, eps, init_stoch, init_deter, params):
    """Run T steps of RSSMTransition inside one pallas_call.

    actions: (T, B, A)   eps: (T, B, S)   init_stoch: (B, S)   init_deter: (B, D)
    Returns mean, std, stoch (each (T, B, S)) and deter (T, B, D).
    """
    T, B, A = actions.shape
    S = init_stoch.shape[-1]
    D = init_deter.shape[-1]
    H = params["w_i3"].shape[0]
    out_w = 3 * S + D

    # batch blocking: a single block at small B; multiple "parallel" blocks at
    # large B (sharded across v7x's 2 TensorCores).  Blocks must be full-B or a
    # multiple of 8 sublanes.
    b_blk = B if B <= 256 else 256
    assert B % b_blk == 0 and (b_blk == B or b_blk % 8 == 0)
    n_bb = B // b_blk

    width = max(H, 3 * D, 2 * S)
    vec_slab = _pack_vec_slab(params, width)

    kernel = _make_kernel(S, D, H)
    w_const = lambda b, t: (0, 0)   # weights: same block every step -> no re-DMA

    grid_spec = pltpu.PrefetchScalarGridSpec(
        num_scalar_prefetch=0,
        grid=(n_bb, T),
        in_specs=[
            pl.BlockSpec((1, b_blk, A), lambda b, t: (t, b, 0)),   # actions
            pl.BlockSpec((1, b_blk, S), lambda b, t: (t, b, 0)),   # eps
            pl.BlockSpec((b_blk, S), lambda b, t: (b, 0)),         # init stoch
            pl.BlockSpec((b_blk, D), lambda b, t: (b, 0)),         # init deter
            pl.BlockSpec((A, H), w_const),                         # w_in (action rows)
            pl.BlockSpec((S, H), w_const),                         # w_in (stoch rows)
            pl.BlockSpec((H, 3 * D), w_const),                     # GRU weight_ih
            pl.BlockSpec((D, 3 * D), w_const),                     # GRU weight_hh
            pl.BlockSpec((D, H), w_const),                         # prior Linear 1
            pl.BlockSpec((H, 2 * S), w_const),                     # prior head
            pl.BlockSpec((len(_VEC_SLAB_KEYS), width), w_const),   # bias/LN slab
        ],
        out_specs=pl.BlockSpec((1, b_blk, out_w), lambda b, t: (t, b, 0)),
        scratch_shapes=[
            pltpu.VMEM((b_blk, S), jnp.float32),   # stoch carry
            pltpu.VMEM((b_blk, D), jnp.float32),   # deter carry
        ],
    )

    packed = pl.pallas_call(
        kernel,
        grid_spec=grid_spec,
        out_shape=jax.ShapeDtypeStruct((T, B, out_w), jnp.float32),
        compiler_params=pltpu.CompilerParams(
            dimension_semantics=("parallel", "arbitrary")),
    )(actions, eps, init_stoch, init_deter,
      params["w_in_a"], params["w_in_s"], params["w_i3"], params["w_h3"],
      params["w1"], params["w_head"], vec_slab)

    mean = packed[..., 0:S]
    std = packed[..., S:2 * S]
    stoch = packed[..., 2 * S:3 * S]
    deter = packed[..., 3 * S:]
    return mean, std, stoch, deter


def rssm_transition_forward(prev_action, prev_stoch, prev_deter, eps, params):
    """Single-step forward (exact semantics of the PyTorch module.forward)."""
    mean, std, stoch, deter = rssm_rollout(
        prev_action[None], eps[None], prev_stoch, prev_deter, params)
    return mean[0], std[0], stoch[0], deter[0]


# ------------------------ pure-JAX reference (for checking) ------------------

def rssm_rollout_ref(actions, eps, init_stoch, init_deter, params):
    p = params
    D = init_deter.shape[-1]
    S = init_stoch.shape[-1]

    def step(carry, xs):
        stoch, deter = carry
        act, e = xs
        rnn_in = _elu(act @ p["w_in_a"] + stoch @ p["w_in_s"] + p["b_in"])
        gi = rnn_in @ p["w_i3"] + p["b_i3"]
        gh = deter @ p["w_h3"] + p["b_h3"]
        r = jax.nn.sigmoid(gi[:, 0:D] + gh[:, 0:D])
        z = jax.nn.sigmoid(gi[:, D:2 * D] + gh[:, D:2 * D])
        n = jnp.tanh(gi[:, 2 * D:] + r * gh[:, 2 * D:])
        h_new = (1.0 - z) * n + z * deter
        deter_new = _layernorm(h_new, p["g_det"], p["be_det"])
        hid = _layernorm(_elu(deter_new @ p["w1"] + p["b1"]), p["g1"], p["be1"])
        head = hid @ p["w_head"] + p["b_head"]
        mean = head[:, 0:S]
        std = _softplus(head[:, S:]) + 0.1
        stoch_new = _layernorm(mean + std * e, p["g_st"], p["be_st"])
        return (stoch_new, deter_new), (mean, std, stoch_new, deter_new)

    _, (mean, std, stoch, deter) = lax.scan(
        step, (init_stoch, init_deter), (actions, eps))
    return mean, std, stoch, deter


# --------------------------- parameter construction --------------------------

def init_params(key, action_size, stoch_size, deter_size, hidden_size):
    """Deterministic synthetic parameters (PyTorch-like uniform init)."""
    A, S, D, H = action_size, stoch_size, deter_size, hidden_size
    ks = jax.random.split(key, 11)

    def uni(k, shape, fan_in):
        bound = 1.0 / jnp.sqrt(jnp.float32(fan_in))
        return jax.random.uniform(k, shape, jnp.float32, -bound, bound)

    p = {}
    # rnn input model: Linear(A+S -> H); W stored transposed, split by rows
    p["w_in_a"] = uni(ks[0], (A, H), A + S)
    p["w_in_s"] = uni(ks[1], (S, H), A + S)
    p["b_in"] = uni(ks[2], (H,), A + S)
    # GRUCell(H -> D): gates packed along output as [r | z | n]
    p["w_i3"] = uni(ks[3], (H, 3 * D), D)
    p["w_h3"] = uni(ks[4], (D, 3 * D), D)
    p["b_i3"] = uni(ks[5], (3 * D,), D)
    p["b_h3"] = uni(ks[6], (3 * D,), D)
    # LayerNorm(deter)
    p["g_det"] = jnp.ones((D,), jnp.float32)
    p["be_det"] = jnp.zeros((D,), jnp.float32)
    # stochastic prior model: Linear(D->H), LayerNorm(H), Linear(H->2S)
    p["w1"] = uni(ks[7], (D, H), D)
    p["b1"] = uni(ks[8], (H,), D)
    p["g1"] = jnp.ones((H,), jnp.float32)
    p["be1"] = jnp.zeros((H,), jnp.float32)
    p["w_head"] = uni(ks[9], (H, 2 * S), H)
    p["b_head"] = uni(ks[10], (2 * S,), H)
    # LayerNorm(stoch)
    p["g_st"] = jnp.ones((S,), jnp.float32)
    p["be_st"] = jnp.zeros((S,), jnp.float32)
    return p


# ---------------------------------- main --------------------------------------

if __name__ == "__main__":
    ACTION_SIZE = 6
    STOCH_SIZE = 8
    DETER_SIZE = 32
    HIDDEN_SIZE = 16
    BATCH = 8     # fill the 8 sublanes
    TIME = 8      # the recurrence runs inside one pallas_call

    root = jax.random.PRNGKey(0)
    k_par, k_act, k_sto, k_det, k_eps = jax.random.split(root, 5)

    params = init_params(k_par, ACTION_SIZE, STOCH_SIZE, DETER_SIZE, HIDDEN_SIZE)

    actions = jax.random.normal(k_act, (TIME, BATCH, ACTION_SIZE), jnp.float32)
    eps = jax.random.normal(k_eps, (TIME, BATCH, STOCH_SIZE), jnp.float32)
    init_stoch = jax.random.normal(k_sto, (BATCH, STOCH_SIZE), jnp.float32)
    init_deter = jax.random.normal(k_det, (BATCH, DETER_SIZE), jnp.float32)

    mean, std, stoch, deter = jax.jit(rssm_rollout)(
        actions, eps, init_stoch, init_deter, params)
    jax.block_until_ready((mean, std, stoch, deter))

    assert mean.shape == (TIME, BATCH, STOCH_SIZE)
    assert std.shape == (TIME, BATCH, STOCH_SIZE)
    assert stoch.shape == (TIME, BATCH, STOCH_SIZE)
    assert deter.shape == (TIME, BATCH, DETER_SIZE)
    assert bool(jnp.all(std > 0.1))

    # numeric check against a pure-JAX reference of the same math (loose tol:
    # MXU f32 matmul precision inside the kernel may differ slightly from the
    # XLA dot used in the reference).
    r_mean, r_std, r_stoch, r_deter = jax.jit(rssm_rollout_ref)(
        actions, eps, init_stoch, init_deter, params)
    for got, ref in ((mean, r_mean), (std, r_std),
                     (stoch, r_stoch), (deter, r_deter)):
        err = float(jnp.max(jnp.abs(got - ref)))
        assert err < 2e-2, err

    # single-step path (the PyTorch module's forward is exactly T=1)
    m1, s1, st1, d1 = jax.jit(rssm_transition_forward)(
        actions[0], init_stoch, init_deter, eps[0], params)
    jax.block_until_ready((m1, s1, st1, d1))
    assert m1.shape == (BATCH, STOCH_SIZE) and d1.shape == (BATCH, DETER_SIZE)

    print("KERNEL_OK")
</pallas_src>

<mosaic_0001>
module attributes {stable_mosaic.version = 11 : i64} {
  func.func @kernel(%arg0: i32, %arg1: i32, %arg2: memref<1x8x6xf32, #tpu.memory_space<vmem>>, %arg3: memref<1x8x8xf32, #tpu.memory_space<vmem>>, %arg4: memref<8x8xf32, #tpu.memory_space<vmem>>, %arg5: memref<8x32xf32, #tpu.memory_space<vmem>>, %arg6: memref<6x16xf32, #tpu.memory_space<vmem>>, %arg7: memref<8x16xf32, #tpu.memory_space<vmem>>, %arg8: memref<16x96xf32, #tpu.memory_space<vmem>>, %arg9: memref<32x96xf32, #tpu.memory_space<vmem>>, %arg10: memref<32x16xf32, #tpu.memory_space<vmem>>, %arg11: memref<16x16xf32, #tpu.memory_space<vmem>>, %arg12: memref<11x96xf32, #tpu.memory_space<vmem>>, %arg13: memref<1x8x56xf32, #tpu.memory_space<vmem>>, %arg14: memref<8x8xf32, #tpu.memory_space<vmem>>, %arg15: memref<8x32xf32, #tpu.memory_space<vmem>>) attributes {dimension_semantics = [#tpu.dimension_semantics<parallel>, #tpu.dimension_semantics<arbitrary>], iteration_bounds = array<i64: 1, 8>, scalar_prefetch = 0 : i64, scratch_operands = 2 : i64, tpu.core_type = #tpu.core_type<tc>, window_params = [{transform_indices = @transform_0, window_bounds = array<i64: 1, 8, 6>}, {transform_indices = @transform_1, window_bounds = array<i64: 1, 8, 8>}, {transform_indices = @transform_2, window_bounds = array<i64: 8, 8>}, {transform_indices = @transform_3, window_bounds = array<i64: 8, 32>}, {pipeline_mode = #tpu.pipeline_mode<synchronous>, transform_indices = @transform_4, window_bounds = array<i64: 6, 16>}, {pipeline_mode = #tpu.pipeline_mode<synchronous>, transform_indices = @transform_5, window_bounds = array<i64: 8, 16>}, {pipeline_mode = #tpu.pipeline_mode<synchronous>, transform_indices = @transform_6, window_bounds = array<i64: 16, 96>}, {pipeline_mode = #tpu.pipeline_mode<synchronous>, transform_indices = @transform_7, window_bounds = array<i64: 32, 96>}, {pipeline_mode = #tpu.pipeline_mode<synchronous>, transform_indices = @transform_8, window_bounds = array<i64: 32, 16>}, {pipeline_mode = #tpu.pipeline_mode<synchronous>, transform_indices = @transform_9, window_bounds = array<i64: 16, 16>}, {pipeline_mode = #tpu.pipeline_mode<synchronous>, transform_indices = @transform_10, window_bounds = array<i64: 11, 96>}, {transform_indices = @transform_11, window_bounds = array<i64: 1, 8, 56>}]} {
    %c0_i32 = arith.constant 0 : i32
    %0 = arith.cmpi eq, %arg1, %c0_i32 : i32
    %1 = arith.extui %0 : i1 to i32
    %c0_i32_0 = arith.constant 0 : i32
    %2 = arith.cmpi ne, %1, %c0_i32_0 : i32
    scf.if %2 {
      %c0_77 = arith.constant 0 : index
      %c0_78 = arith.constant 0 : index
      %174 = vector.load %arg4[%c0_77, %c0_78] : memref<8x8xf32, #tpu.memory_space<vmem>>, vector<8x8xf32>
      %c0_79 = arith.constant 0 : index
      %c0_80 = arith.constant 0 : index
      %175 = vector.load %arg14[%c0_79, %c0_80] : memref<8x8xf32, #tpu.memory_space<vmem>>, vector<8x8xf32>
      tpu.vector_store %arg14[%c0_79, %c0_80], %174 {strides = array<i32>} : memref<8x8xf32, #tpu.memory_space<vmem>>, vector<8x8xf32>,
      %c0_81 = arith.constant 0 : index
      %c0_82 = arith.constant 0 : index
      %176 = vector.load %arg5[%c0_81, %c0_82] : memref<8x32xf32, #tpu.memory_space<vmem>>, vector<8x32xf32>
      %c0_83 = arith.constant 0 : index
      %c0_84 = arith.constant 0 : index
      %177 = vector.load %arg15[%c0_83, %c0_84] : memref<8x32xf32, #tpu.memory_space<vmem>>, vector<8x32xf32>
      tpu.vector_store %arg15[%c0_83, %c0_84], %176 {strides = array<i32>} : memref<8x32xf32, #tpu.memory_space<vmem>>, vector<8x32xf32>,
    } else {
    }
    %c0 = arith.constant 0 : index
    %c0_1 = arith.constant 0 : index
    %c0_2 = arith.constant 0 : index
    %3 = vector.load %arg2[%c0, %c0_1, %c0_2] : memref<1x8x6xf32, #tpu.memory_space<vmem>>, vector<1x8x6xf32>
    %4 = vector.shape_cast %3 : vector<1x8x6xf32> to vector<8x6xf32>
    %c0_3 = arith.constant 0 : index
    %c0_4 = arith.constant 0 : index
    %c0_5 = arith.constant 0 : index
    %5 = vector.load %arg3[%c0_3, %c0_4, %c0_5] : memref<1x8x8xf32, #tpu.memory_space<vmem>>, vector<1x8x8xf32>
    %6 = vector.shape_cast %5 : vector<1x8x8xf32> to vector<8x8xf32>
    %c0_6 = arith.constant 0 : index
    %c0_7 = arith.constant 0 : index
    %7 = vector.load %arg14[%c0_6, %c0_7] : memref<8x8xf32, #tpu.memory_space<vmem>>, vector<8x8xf32>
    %c0_8 = arith.constant 0 : index
    %c0_9 = arith.constant 0 : index
    %8 = vector.load %arg15[%c0_8, %c0_9] : memref<8x32xf32, #tpu.memory_space<vmem>>, vector<8x32xf32>
    %c0_10 = arith.constant 0 : index
    %c0_11 = arith.constant 0 : index
    %9 = vector.load %arg6[%c0_10, %c0_11] : memref<6x16xf32, #tpu.memory_space<vmem>>, vector<6x16xf32>
    %cst = arith.constant dense<0.000000e+00> : vector<8x16xf32>
    %10 = tpu.matmul %4, %9, %cst {dimension_numbers = #tpu.dot_dimension_numbers<[1], [0], [0], [1], [0, 0, 1, 1], [], []>} : vector<8x6xf32>, vector<6x16xf32>, vector<8x16xf32> -> vector<8x16xf32>
    %c0_12 = arith.constant 0 : index
    %c0_13 = arith.constant 0 : index
    %11 = vector.load %arg7[%c0_12, %c0_13] : memref<8x16xf32, #tpu.memory_space<vmem>>, vector<8x16xf32>
    %cst_14 = arith.constant dense<0.000000e+00> : vector<8x16xf32>
    %12 = tpu.matmul %7, %11, %cst_14 {dimension_numbers = #tpu.dot_dimension_numbers<[1], [0], [0], [1], [0, 0, 1, 1], [], []>} : vector<8x8xf32>, vector<8x16xf32>, vector<8x16xf32> -> vector<8x16xf32>
    %13 = arith.addf %10, %12 : vector<8x16xf32>
    %c0_15 = arith.constant 0 : index
    %c0_16 = arith.constant 0 : index
    %14 = vector.load %arg12[%c0_15, %c0_16] : memref<11x96xf32, #tpu.memory_space<vmem>>, vector<1x16xf32>
    %15 = vector.broadcast %14 : vector<1x16xf32> to vector<8x16xf32>
    %16 = arith.addf %13, %15 : vector<8x16xf32>
    %cst_17 = arith.constant 0.000000e+00 : f32
    %17 = vector.broadcast %cst_17 : f32 to vector<8x16xf32>
    %18 = arith.cmpf ogt, %16, %17 : vector<8x16xf32>
    %cst_18 = arith.constant 0.000000e+00 : f32
    %19 = vector.broadcast %cst_18 : f32 to vector<8x16xf32>
    %20 = arith.minimumf %16, %19 : vector<8x16xf32>
    %cst_19 = arith.constant 5.000000e-01 : f32
    %21 = vector.broadcast %cst_19 : f32 to vector<8x16xf32>
    %22 = arith.mulf %21, %20 : vector<8x16xf32>
    %23 = math.tanh %22 : vector<8x16xf32>
    %cst_20 = arith.constant 2.000000e+00 : f32
    %24 = vector.broadcast %cst_20 : f32 to vector<8x16xf32>
    %25 = arith.mulf %24, %23 : vector<8x16xf32>
    %cst_21 = arith.constant 1.000000e+00 : f32
    %26 = vector.broadcast %cst_21 : f32 to vector<8x16xf32>
    %27 = arith.subf %26, %23 : vector<8x16xf32>
    %28 = arith.divf %25, %27 : vector<8x16xf32>
    %29 = arith.select %18, %16, %28 : vector<8x16xi1>, vector<8x16xf32>
    %c0_22 = arith.constant 0 : index
    %c0_23 = arith.constant 0 : index
    %30 = vector.load %arg8[%c0_22, %c0_23] : memref<16x96xf32, #tpu.memory_space<vmem>>, vector<16x96xf32>
    %cst_24 = arith.constant dense<0.000000e+00> : vector<8x96xf32>
    %31 = tpu.matmul %29, %30, %cst_24 {dimension_numbers = #tpu.dot_dimension_numbers<[1], [0], [0], [1], [0, 0, 1, 1], [], []>} : vector<8x16xf32>, vector<16x96xf32>, vector<8x96xf32> -> vector<8x96xf32>
    %c1 = arith.constant 1 : index
    %c0_25 = arith.constant 0 : index
    %32 = vector.load %arg12[%c1, %c0_25] : memref<11x96xf32, #tpu.memory_space<vmem>>, vector<1x96xf32>
    %33 = vector.broadcast %32 : vector<1x96xf32> to vector<8x96xf32>
    %34 = arith.addf %31, %33 : vector<8x96xf32>
    %c0_26 = arith.constant 0 : index
    %c0_27 = arith.constant 0 : index
    %35 = vector.load %arg9[%c0_26, %c0_27] : memref<32x96xf32, #tpu.memory_space<vmem>>, vector<32x96xf32>
    %cst_28 = arith.constant dense<0.000000e+00> : vector<8x96xf32>
    %36 = tpu.matmul %8, %35, %cst_28 {dimension_numbers = #tpu.dot_dimension_numbers<[1], [0], [0], [1], [0, 0, 1, 1], [], []>} : vector<8x32xf32>, vector<32x96xf32>, vector<8x96xf32> -> vector<8x96xf32>
    %c2 = arith.constant 2 : index
    %c0_29 = arith.constant 0 : index
    %37 = vector.load %arg12[%c2, %c0_29] : memref<11x96xf32, #tpu.memory_space<vmem>>, vector<1x96xf32>
    %38 = vector.broadcast %37 : vector<1x96xf32> to vector<8x96xf32>
    %39 = arith.addf %36, %38 : vector<8x96xf32>
    %40 = vector.extract_strided_slice %34 {offsets = [0, 0], sizes = [8, 32], strides = [1, 1]} : vector<8x96xf32> to vector<8x32xf32>
    %41 = vector.extract_strided_slice %39 {offsets = [0, 0], sizes = [8, 32], strides = [1, 1]} : vector<8x96xf32> to vector<8x32xf32>
    %42 = arith.addf %40, %41 : vector<8x32xf32>
    %43 = arith.negf %42 : vector<8x32xf32>
    %44 = math.exp %43 : vector<8x32xf32>
    %cst_30 = arith.constant 1.000000e+00 : f32
    %45 = vector.broadcast %cst_30 : f32 to vector<8x32xf32>
    %46 = arith.addf %45, %44 : vector<8x32xf32>
    %47 = arith.divf %45, %46 : vector<8x32xf32>
    %48 = vector.extract_strided_slice %34 {offsets = [0, 32], sizes = [8, 32], strides = [1, 1]} : vector<8x96xf32> to vector<8x32xf32>
    %49 = vector.extract_strided_slice %39 {offsets = [0, 32], sizes = [8, 32], strides = [1, 1]} : vector<8x96xf32> to vector<8x32xf32>
    %50 = arith.addf %48, %49 : vector<8x32xf32>
    %51 = arith.negf %50 : vector<8x32xf32>
    %52 = math.exp %51 : vector<8x32xf32>
    %cst_31 = arith.constant 1.000000e+00 : f32
    %53 = vector.broadcast %cst_31 : f32 to vector<8x32xf32>
    %54 = arith.addf %53, %52 : vector<8x32xf32>
    %55 = arith.divf %53, %54 : vector<8x32xf32>
    %56 = vector.extract_strided_slice %34 {offsets = [0, 64], sizes = [8, 32], strides = [1, 1]} : vector<8x96xf32> to vector<8x32xf32>
    %57 = vector.extract_strided_slice %39 {offsets = [0, 64], sizes = [8, 32], strides = [1, 1]} : vector<8x96xf32> to vector<8x32xf32>
    %58 = arith.mulf %47, %57 : vector<8x32xf32>
    %59 = arith.addf %56, %58 : vector<8x32xf32>
    %60 = math.tanh %59 : vector<8x32xf32>
    %cst_32 = arith.constant 1.000000e+00 : f32
    %61 = vector.broadcast %cst_32 : f32 to vector<8x32xf32>
    %62 = arith.subf %61, %55 : vector<8x32xf32>
    %63 = arith.mulf %62, %60 : vector<8x32xf32>
    %64 = arith.mulf %55, %8 : vector<8x32xf32>
    %65 = arith.addf %63, %64 : vector<8x32xf32>
    %c3 = arith.constant 3 : index
    %c0_33 = arith.constant 0 : index
    %66 = vector.load %arg12[%c3, %c0_33] : memref<11x96xf32, #tpu.memory_space<vmem>>, vector<1x32xf32>
    %c4 = arith.constant 4 : index
    %c0_34 = arith.constant 0 : index
    %67 = vector.load %arg12[%c4, %c0_34] : memref<11x96xf32, #tpu.memory_space<vmem>>, vector<1x32xf32>
    %cst_35 = arith.constant dense<0.000000e+00> : vector<8xf32>
    %68 = vector.multi_reduction <add>, %65, %cst_35 [1] : vector<8x32xf32> to vector<8xf32>
    %69 = vector.shape_cast %68 : vector<8xf32> to vector<8x1xf32>
    %cst_36 = arith.constant 3.200000e+01 : f32
    %70 = vector.broadcast %cst_36 : f32 to vector<8x1xf32>
    %71 = arith.divf %69, %70 : vector<8x1xf32>
    %72 = vector.broadcast %71 : vector<8x1xf32> to vector<8x32xf32>
    %73 = arith.subf %65, %72 : vector<8x32xf32>
    %74 = arith.mulf %73, %73 : vector<8x32xf32>
    %cst_37 = arith.constant dense<0.000000e+00> : vector<8xf32>
    %75 = vector.multi_reduction <add>, %74, %cst_37 [1] : vector<8x32xf32> to vector<8xf32>
    %76 = vector.shape_cast %75 : vector<8xf32> to vector<8x1xf32>
    %cst_38 = arith.constant 3.200000e+01 : f32
    %77 = vector.broadcast %cst_38 : f32 to vector<8x1xf32>
    %78 = arith.divf %76, %77 : vector<8x1xf32>
    %cst_39 = arith.constant 9.99999974E-6 : f32
    %79 = vector.broadcast %cst_39 : f32 to vector<8x1xf32>
    %80 = arith.addf %78, %79 : vector<8x1xf32>
    %81 = math.rsqrt %80 : vector<8x1xf32>
    %82 = vector.broadcast %81 : vector<8x1xf32> to vector<8x32xf32>
    %83 = arith.mulf %73, %82 : vector<8x32xf32>
    %84 = vector.broadcast %66 : vector<1x32xf32> to vector<8x32xf32>
    %85 = arith.mulf %83, %84 : vector<8x32xf32>
    %86 = vector.broadcast %67 : vector<1x32xf32> to vector<8x32xf32>
    %87 = arith.addf %85, %86 : vector<8x32xf32>
    %c0_40 = arith.constant 0 : index
    %c0_41 = arith.constant 0 : index
    %88 = vector.load %arg10[%c0_40, %c0_41] : memref<32x16xf32, #tpu.memory_space<vmem>>, vector<32x16xf32>
    %cst_42 = arith.constant dense<0.000000e+00> : vector<8x16xf32>
    %89 = tpu.matmul %87, %88, %cst_42 {dimension_numbers = #tpu.dot_dimension_numbers<[1], [0], [0], [1], [0, 0, 1, 1], [], []>} : vector<8x32xf32>, vector<32x16xf32>, vector<8x16xf32> -> vector<8x16xf32>
    %c5 = arith.constant 5 : index
    %c0_43 = arith.constant 0 : index
    %90 = vector.load %arg12[%c5, %c0_43] : memref<11x96xf32, #tpu.memory_space<vmem>>, vector<1x16xf32>
    %91 = vector.broadcast %90 : vector<1x16xf32> to vector<8x16xf32>
    %92 = arith.addf %89, %91 : vector<8x16xf32>
    %cst_44 = arith.constant 0.000000e+00 : f32
    %93 = vector.broadcast %cst_44 : f32 to vector<8x16xf32>
    %94 = arith.cmpf ogt, %92, %93 : vector<8x16xf32>
    %cst_45 = arith.constant 0.000000e+00 : f32
    %95 = vector.broadcast %cst_45 : f32 to vector<8x16xf32>
    %96 = arith.minimumf %92, %95 : vector<8x16xf32>
    %cst_46 = arith.constant 5.000000e-01 : f32
    %97 = vector.broadcast %cst_46 : f32 to vector<8x16xf32>
    %98 = arith.mulf %97, %96 : vector<8x16xf32>
    %99 = math.tanh %98 : vector<8x16xf32>
    %cst_47 = arith.constant 2.000000e+00 : f32
    %100 = vector.broadcast %cst_47 : f32 to vector<8x16xf32>
    %101 = arith.mulf %100, %99 : vector<8x16xf32>
    %cst_48 = arith.constant 1.000000e+00 : f32
    %102 = vector.broadcast %cst_48 : f32 to vector<8x16xf32>
    %103 = arith.subf %102, %99 : vector<8x16xf32>
    %104 = arith.divf %101, %103 : vector<8x16xf32>
    %105 = arith.select %94, %92, %104 : vector<8x16xi1>, vector<8x16xf32>
    %c6 = arith.constant 6 : index
    %c0_49 = arith.constant 0 : index
    %106 = vector.load %arg12[%c6, %c0_49] : memref<11x96xf32, #tpu.memory_space<vmem>>, vector<1x16xf32>
    %c7 = arith.constant 7 : index
    %c0_50 = arith.constant 0 : index
    %107 = vector.load %arg12[%c7, %c0_50] : memref<11x96xf32, #tpu.memory_space<vmem>>, vector<1x16xf32>
    %cst_51 = arith.constant dense<0.000000e+00> : vector<8xf32>
    %108 = vector.multi_reduction <add>, %105, %cst_51 [1] : vector<8x16xf32> to vector<8xf32>
    %109 = vector.shape_cast %108 : vector<8xf32> to vector<8x1xf32>
    %cst_52 = arith.constant 1.600000e+01 : f32
    %110 = vector.broadcast %cst_52 : f32 to vector<8x1xf32>
    %111 = arith.divf %109, %110 : vector<8x1xf32>
    %112 = vector.broadcast %111 : vector<8x1xf32> to vector<8x16xf32>
    %113 = arith.subf %105, %112 : vector<8x16xf32>
    %114 = arith.mulf %113, %113 : vector<8x16xf32>
    %cst_53 = arith.constant dense<0.000000e+00> : vector<8xf32>
    %115 = vector.multi_reduction <add>, %114, %cst_53 [1] : vector<8x16xf32> to vector<8xf32>
    %116 = vector.shape_cast %115 : vector<8xf32> to vector<8x1xf32>
    %cst_54 = arith.constant 1.600000e+01 : f32
    %117 = vector.broadcast %cst_54 : f32 to vector<8x1xf32>
    %118 = arith.divf %116, %117 : vector<8x1xf32>
    %cst_55 = arith.constant 9.99999974E-6 : f32
    %119 = vector.broadcast %cst_55 : f32 to vector<8x1xf32>
    %120 = arith.addf %118, %119 : vector<8x1xf32>
    %121 = math.rsqrt %120 : vector<8x1xf32>
    %122 = vector.broadcast %121 : vector<8x1xf32> to vector<8x16xf32>
    %123 = arith.mulf %113, %122 : vector<8x16xf32>
    %124 = vector.broadcast %106 : vector<1x16xf32> to vector<8x16xf32>
    %125 = arith.mulf %123, %124 : vector<8x16xf32>
    %126 = vector.broadcast %107 : vector<1x16xf32> to vector<8x16xf32>
    %127 = arith.addf %125, %126 : vector<8x16xf32>
    %c0_56 = arith.constant 0 : index
    %c0_57 = arith.constant 0 : index
    %128 = vector.load %arg11[%c0_56, %c0_57] : memref<16x16xf32, #tpu.memory_space<vmem>>, vector<16x16xf32>
    %cst_58 = arith.constant dense<0.000000e+00> : vector<8x16xf32>
    %129 = tpu.matmul %127, %128, %cst_58 {dimension_numbers = #tpu.dot_dimension_numbers<[1], [0], [0], [1], [0, 0, 1, 1], [], []>} : vector<8x16xf32>, vector<16x16xf32>, vector<8x16xf32> -> vector<8x16xf32>
    %c8 = arith.constant 8 : index
    %c0_59 = arith.constant 0 : index
    %130 = vector.load %arg12[%c8, %c0_59] : memref<11x96xf32, #tpu.memory_space<vmem>>, vector<1x16xf32>
    %131 = vector.broadcast %130 : vector<1x16xf32> to vector<8x16xf32>
    %132 = arith.addf %129, %131 : vector<8x16xf32>
    %133 = vector.extract_strided_slice %132 {offsets = [0, 0], sizes = [8, 8], strides = [1, 1]} : vector<8x16xf32> to vector<8x8xf32>
    %134 = vector.extract_strided_slice %132 {offsets = [0, 8], sizes = [8, 8], strides = [1, 1]} : vector<8x16xf32> to vector<8x8xf32>
    %cst_60 = arith.constant 2.000000e+01 : f32
    %135 = vector.broadcast %cst_60 : f32 to vector<8x8xf32>
    %136 = arith.cmpf ogt, %134, %135 : vector<8x8xf32>
    %cst_61 = arith.constant 2.000000e+01 : f32
    %137 = vector.broadcast %cst_61 : f32 to vector<8x8xf32>
    %138 = arith.minimumf %134, %137 : vector<8x8xf32>
    %139 = math.exp %138 : vector<8x8xf32>
    %140 = math.log1p %139 : vector<8x8xf32>
    %141 = arith.select %136, %134, %140 : vector<8x8xi1>, vector<8x8xf32>
    %cst_62 = arith.constant 1.000000e-01 : f32
    %142 = vector.broadcast %cst_62 : f32 to vector<8x8xf32>
    %143 = arith.addf %141, %142 : vector<8x8xf32>
    %144 = arith.mulf %143, %6 : vector<8x8xf32>
    %145 = arith.addf %133, %144 : vector<8x8xf32>
    %c9 = arith.constant 9 : index
    %c0_63 = arith.constant 0 : index
    %146 = vector.load %arg12[%c9, %c0_63] : memref<11x96xf32, #tpu.memory_space<vmem>>, vector<1x8xf32>
    %c10 = arith.constant 10 : index
    %c0_64 = arith.constant 0 : index
    %147 = vector.load %arg12[%c10, %c0_64] : memref<11x96xf32, #tpu.memory_space<vmem>>, vector<1x8xf32>
    %cst_65 = arith.constant dense<0.000000e+00> : vector<8xf32>
    %148 = vector.multi_reduction <add>, %145, %cst_65 [1] : vector<8x8xf32> to vector<8xf32>
    %149 = vector.shape_cast %148 : vector<8xf32> to vector<8x1xf32>
    %cst_66 = arith.constant 8.000000e+00 : f32
    %150 = vector.broadcast %cst_66 : f32 to vector<8x1xf32>
    %151 = arith.divf %149, %150 : vector<8x1xf32>
    %152 = vector.broadcast %151 : vector<8x1xf32> to vector<8x8xf32>
    %153 = arith.subf %145, %152 : vector<8x8xf32>
    %154 = arith.mulf %153, %153 : vector<8x8xf32>
    %cst_67 = arith.constant dense<0.000000e+00> : vector<8xf32>
    %155 = vector.multi_reduction <add>, %154, %cst_67 [1] : vector<8x8xf32> to vector<8xf32>
    %156 = vector.shape_cast %155 : vector<8xf32> to vector<8x1xf32>
    %cst_68 = arith.constant 8.000000e+00 : f32
    %157 = vector.broadcast %cst_68 : f32 to vector<8x1xf32>
    %158 = arith.divf %156, %157 : vector<8x1xf32>
    %cst_69 = arith.constant 9.99999974E-6 : f32
    %159 = vector.broadcast %cst_69 : f32 to vector<8x1xf32>
    %160 = arith.addf %158, %159 : vector<8x1xf32>
    %161 = math.rsqrt %160 : vector<8x1xf32>
    %162 = vector.broadcast %161 : vector<8x1xf32> to vector<8x8xf32>
    %163 = arith.mulf %153, %162 : vector<8x8xf32>
    %164 = vector.broadcast %146 : vector<1x8xf32> to vector<8x8xf32>
    %165 = arith.mulf %163, %164 : vector<8x8xf32>
    %166 = vector.broadcast %147 : vector<1x8xf32> to vector<8x8xf32>
    %167 = arith.addf %165, %166 : vector<8x8xf32>
    %c0_70 = arith.constant 0 : index
    %c0_71 = arith.constant 0 : index
    %168 = vector.load %arg14[%c0_70, %c0_71] : memref<8x8xf32, #tpu.memory_space<vmem>>, vector<8x8xf32>
    tpu.vector_store %arg14[%c0_70, %c0_71], %167 {strides = array<i32>} : memref<8x8xf32, #tpu.memory_space<vmem>>, vector<8x8xf32>,
    %c0_72 = arith.constant 0 : index
    %c0_73 = arith.constant 0 : index
    %169 = vector.load %arg15[%c0_72, %c0_73] : memref<8x32xf32, #tpu.memory_space<vmem>>, vector<8x32xf32>
    tpu.vector_store %arg15[%c0_72, %c0_73], %87 {strides = array<i32>} : memref<8x32xf32, #tpu.memory_space<vmem>>, vector<8x32xf32>,
    %170 = tpu.concatenate %133, %143, %167, %87 in 1 : vector<8x8xf32>, vector<8x8xf32>, vector<8x8xf32>, vector<8x32xf32> -> vector<8x56xf32>
    %c0_74 = arith.constant 0 : index
    %c0_75 = arith.constant 0 : index
    %c0_76 = arith.constant 0 : index
    %171 = vector.load %arg13[%c0_74, %c0_75, %c0_76] : memref<1x8x56xf32, #tpu.memory_space<vmem>>, vector<1x8x56xf32>
    %172 = vector.shape_cast %171 : vector<1x8x56xf32> to vector<8x56xf32>
    %173 = vector.shape_cast %170 : vector<8x56xf32> to vector<1x8x56xf32>
    tpu.vector_store %arg13[%c0_74, %c0_75, %c0_76], %173 {strides = array<i32>} : memref<1x8x56xf32, #tpu.memory_space<vmem>>, vector<1x8x56xf32>,
    return
  }
  func.func @transform_0(%arg0: i32, %arg1: i32) -> (i32, i32, i32) {
    %c0_i32 = arith.constant 0 : i32
    %c0_i32_0 = arith.constant 0 : i32
    return %arg1, %arg0, %c0_i32 : i32, i32, i32
  }
  func.func @transform_1(%arg0: i32, %arg1: i32) -> (i32, i32, i32) {
    %c0_i32 = arith.constant 0 : i32
    %c0_i32_0 = arith.constant 0 : i32
    return %arg1, %arg0, %c0_i32 : i32, i32, i32
  }
  func.func @transform_2(%arg0: i32, %arg1: i32) -> (i32, i32) {
    %c0_i32 = arith.constant 0 : i32
    %c0_i32_0 = arith.constant 0 : i32
    return %arg0, %c0_i32 : i32, i32
  }
  func.func @transform_3(%arg0: i32, %arg1: i32) -> (i32, i32) {
    %c0_i32 = arith.constant 0 : i32
    %c0_i32_0 = arith.constant 0 : i32
    return %arg0, %c0_i32 : i32, i32
  }
  func.func @transform_4(%arg0: i32, %arg1: i32) -> (i32, i32) {
    %c0_i32 = arith.constant 0 : i32
    %c0_i32_0 = arith.constant 0 : i32
    %c0_i32_1 = arith.constant 0 : i32
    return %c0_i32, %c0_i32_0 : i32, i32
  }
  func.func @transform_5(%arg0: i32, %arg1: i32) -> (i32, i32) {
    %c0_i32 = arith.constant 0 : i32
    %c0_i32_0 = arith.constant 0 : i32
    %c0_i32_1 = arith.constant 0 : i32
    return %c0_i32, %c0_i32_0 : i32, i32
  }
  func.func @transform_6(%arg0: i32, %arg1: i32) -> (i32, i32) {
    %c0_i32 = arith.constant 0 : i32
    %c0_i32_0 = arith.constant 0 : i32
    %c0_i32_1 = arith.constant 0 : i32
    return %c0_i32, %c0_i32_0 : i32, i32
  }
  func.func @transform_7(%arg0: i32, %arg1: i32) -> (i32, i32) {
    %c0_i32 = arith.constant 0 : i32
    %c0_i32_0 = arith.constant 0 : i32
    %c0_i32_1 = arith.constant 0 : i32
    return %c0_i32, %c0_i32_0 : i32, i32
  }
  func.func @transform_8(%arg0: i32, %arg1: i32) -> (i32, i32) {
    %c0_i32 = arith.constant 0 : i32
    %c0_i32_0 = arith.constant 0 : i32
    %c0_i32_1 = arith.constant 0 : i32
    return %c0_i32, %c0_i32_0 : i32, i32
  }
  func.func @transform_9(%arg0: i32, %arg1: i32) -> (i32, i32) {
    %c0_i32 = arith.constant 0 : i32
    %c0_i32_0 = arith.constant 0 : i32
    %c0_i32_1 = arith.constant 0 : i32
    return %c0_i32, %c0_i32_0 : i32, i32
  }
  func.func @transform_10(%arg0: i32, %arg1: i32) -> (i32, i32) {
    %c0_i32 = arith.constant 0 : i32
    %c0_i32_0 = arith.constant 0 : i32
    %c0_i32_1 = arith.constant 0 : i32
    return %c0_i32, %c0_i32_0 : i32, i32
  }
  func.func @transform_11(%arg0: i32, %arg1: i32) -> (i32, i32, i32) {
    %c0_i32 = arith.constant 0 : i32
    %c0_i32_0 = arith.constant 0 : i32
    return %arg1, %arg0, %c0_i32 : i32, i32, i32
  }
}

</mosaic_0001>

<bundles_post_ra>
// kernel: rssm_rollout.1
= control target key start
LH: loop header
LB: loop body
LE: loop exit
PB: predicated region body
PF: predicated region fallthrough
CT: control target
= control target key end

     0   :  { %s1545_s17 = smov 0   ;;  %s1547_s18 = smov 0   ;;  %s1720_s0 = inlined_call_operand.vmem [shape: f32[8,8,6], index: 0, kind: input, shape index: {}]   ;;  %s1721_s1 = inlined_call_operand.vmem [shape: f32[8,8,8], index: 1, kind: input, shape index: {}]   ;;  %s1722_s2 = inlined_call_operand.vmem [shape: f32[8,8], index: 2, kind: input, shape index: {}]   ;;  %s1723_s3 = inlined_call_operand.vmem [shape: f32[8,32], index: 3, kind: input, shape index: {}]   ;;  %s1724_s4 = inlined_call_operand.vmem [shape: f32[6,16], index: 4, kind: input, shape index: {}]   ;;  %s1725_s5 = inlined_call_operand.vmem [shape: f32[8,16], index: 5, kind: input, shape index: {}]   ;;  %s1726_s6 = inlined_call_operand.vmem [shape: f32[16,96], index: 6, kind: input, shape index: {}]   ;;  %s1727_s7 = inlined_call_operand.vmem [shape: f32[32,96], index: 7, kind: input, shape index: {}]   ;;  %s1728_s8 = inlined_call_operand.vmem [shape: f32[32,16], index: 8, kind: input, shape index: {}]   ;;  %s1729_s9 = inlined_call_operand.vmem [shape: f32[16,16], index: 9, kind: input, shape index: {}]   ;;  %s1730_s10 = inlined_call_operand.vmem [shape: f32[11,96], index: 10, kind: input, shape index: {}]   ;;  %s1731_s11 = inlined_call_operand.vmem [shape: f32[8,8,56], index: 11, kind: output, shape index: {}]  }
   0x1   :  { %s1549_s19 = smov 0  }
   0x2 LB: > { %s30_s20 = sadd.s32 1, %s1470_s18  ;;  %p1285_p0 = scmp.ge.s32.totalorder %s1474_s19, 1  ;;  %s1474_s19 = sphi %s1549_s19, %s21_s19   ;;  %s1470_s18 = sphi %s1547_s18, %s1733_s18   ;;  %s1466_s17 = sphi %s1545_s17, %s1732_s17  }
   0x3   : > { %p31_p1 = scmp.ge.s32.totalorder %s30_s20, 8  ;;  %p387_p2 = scmp.lt.s32.totalorder %s1474_s19, 9 }
   0x5   : > { %s1735_s20 = smov (%p31_p1, %s30_s20), 0  ;;  %p388_p3 = pnand %p1285_p0, %p387_p2 }
   0x6   : > { %p446_p4 = scmp.lt.s32.totalorder (!%p388_p3), %s1466_s17, 7  ;;  %p1289_p5 = scmp.ne.s32.totalorder (!%p388_p3), %s1466_s17, 0 }
   0x7   : > { %391 = sbr.rel (%p388_p3) target bundleno = 2782 (0xade), region = 64 }
   0xe   : > { %s447_s21 = scalar_select %p446_p4, %s1466_s17, 7 }
   0xf   : > { %478 = sbr.rel (%p1289_p5) target bundleno = 22 (0x16), region = 68  ;;  %v479_v0 = vld [vmem:[%s1722_s2] sm:$0xff] (!%p1289_p5)  ;;  %vm480_vm0 = vcmask (!%p1289_p5), 64512   ;;  %vm483_vm1 = vcmask (!%p1289_p5), 261120  }
  0x10   : > { %s1563_s22 = sshll.u32 %s447_s21, 3  ;;  %v482_v1 = vld [vmem:[%s1723_s3] sm:$0xff] (!%p1289_p5)  ;;  %481 = vst.msk [vmem:[#allocation2] sm:$0xff] (!%p1289_p5), %vm480_vm0, %v479_v0 }
  0x11   : > { %s452_s25 = scalar_lea.vmem %s1720_s0, %s1563_s22  ;;  %s459_s28 = scalar_lea.vmem %s1721_s1, %s1563_s22  ;;  %484 = vst.msk [vmem:[#allocation3] sm:$0xff] (!%p1289_p5), %vm483_vm1, %v482_v1 }
  0x12   : > { %s474_s12 = scalar_lea.vmem %s1731_s11, %s1563_s22 }
  0x16 PF: > { %v490_v2 = vld [vmem:[%s1725_s5] sm:$0xff]  ;;  %vm569_vm2 = vcmask 1045504   ;;  %v1476_v4 = vmov 0.0   ;;  %vm491_vm3 = vcmask 64512   ;;  %vm565_vm4 = vcmask 48128   ;;  %v740_v8 = vld [vmem:[%s1727_s7 + $0x8] sm:$0xff] }
  0x17   : > { %v489_v3 = vld [vmem:[%s1724_s4] sm:$0x3f]  ;;  %1331 = vmatprep.subr.mxu0 %v1476_v4  ;;  %1336 = vmatprep.subr.mxu1 %v1476_v4  ;;  %vm1477_vm5 = vmmov 0   ;;  %v741_v10 = vld [vmem:[%s1727_s7 + $0x10] sm:$0xff]  ;;  %v742_v11 = vld [vmem:[%s1727_s7 + $0x18] sm:$0xff]  ;;  %v1478_v12 = vmov 0.0|0.0  }
  0x18   : > { %v487_v5 = vld [vmem:[#allocation2] sm:$0xff]  ;;  %1332 = vmatpush3.msra.mxu0 %v490_v2  ;;  %1333 = vmatprep.mubr.msk.f32.mxu0 %vm1477_vm5, %v1476_v4  ;;  %v1384_v13 = vpack.c.bf16 %v742_v11, %v741_v10  ;;  %v488_v14 = vld [vmem:[#allocation3] sm:$0xff]  ;;  %vm748_vm6 = vcmask 261120   ;;  %s1479_s30 = smov 64   ;;  %vm665_vm7 = vcmask 130048   ;;  %s1480_s14 = smov 96  }
  0x19   : > { %v485_v6 = vld [vmem:[%s452_s25] sm:$0xff]  ;;  %1337 = vmatpush3.msk.msra.mxu1 %vm569_vm2, %v489_v3  ;;  %1338 = vmatprep.mubr.msk.f32.mxu1 %vm1477_vm5, %v1476_v4  ;;  %v659_v16 = vld [vmem:[%s1726_s6 + $0x8] sm:$0xff]  ;;  %s1481_s15 = smov 32   ;;  %s1482_s29 = smov 8   ;;  %vm1155_vm12 = vcmask 195584   ;;  %vm1157_vm13 = vcmask 457728  }
  0x1a   : > { %v739_v7 = vld [vmem:[%s1727_s7] sm:$0xff]  ;;  %1334 = vmatmul.mubr.msk.f32.vlgmr.msra.gmra.mrb[0].mxu0 %vm491_vm3, %v487_v5  ;;  %1339 = vmatmul.mubr.msk.f32.vlgmr.msra.gmra.mrb[0].mxu1 %vm565_vm4, %v485_v6  ;;  %v895_v5 = vld [vmem:[%s1728_s8 + $0x10] sm:$0xff]  ;;  %s1483_s21 = smov 120   ;;  %s1484_s26 = smov 16  }
  0x1b   : > { %v1381_v9 = vpack.c.bf16 %v740_v8, %v739_v7  ;;  %1380 = vmatprep.subr.bf16.mxu1 %v1478_v12  ;;  %1356 = vmatprep.mubr.msk.f32.mxu1 %vm1477_vm5, %v1476_v4  ;;  %v658_v15 = vld [vmem:[%s1726_s6] sm:$0xff]  ;;  %v896_v7 = vld [vmem:[%s1728_s8 + $0x18] sm:$0xff] }
  0x1c   : > { %1377 = vmatprep.subr.bf16.mxu0 %v1478_v12  ;;  %1345 = vmatprep.mubr.msk.f32.mxu0 %vm1477_vm5, %v1476_v4  ;;  %v1378_v17 = vpack.c.bf16 %v659_v16, %v658_v15  ;;  %v1293_v20 = vld [vmem:[%s1730_s10] ss:$0 sm:$0xff]  ;;  %v1296_v27 = vld [vmem:[%s1730_s10 + $0x2] ss:$0 sm:$0xff]  ;;  %v1294_v37 = vld [vmem:[%s1730_s10 + $0x1] ss:$0 sm:$0xff]  ;;  %v1390_v8 = vpack.c.bf16 %v896_v7, %v895_v5 }
  0x1d   : > { %1382 = vmatpush3.bf16.msra.mxu1 %v1381_v9  ;;  %v1299_v59 = vld [vmem:[%s1730_s10 + $0x3] ss:$0 sm:$0xff]  ;;  %v1300_v2 = vld [vmem:[%s1730_s10 + $0x4] ss:$0 sm:$0xff] }
  0x1e   : > { %1383 = vmatprep.subr.bf16.mxu1 %v1478_v12  ;;  %1379 = vmatpush3.bf16.msra.mxu0 %v1378_v17  ;;  %v893_v3 = vld [vmem:[%s1728_s8] sm:$0xff] }
  0x1f   : > { %1386 = vmatprep.subr.bf16.mxu0 %v1478_v12 }
  0x21   : > { %1385 = vmatpush3.bf16.msra.mxu1 %v1384_v13 }
  0x22   : > { %1392 = vmatprep.subr.bf16.mxu1 %v1478_v12 }
  0x24   : > { %1357 = vmatmul.mubr.msk.f32.vlgmr.msra.gmra.mrb[2].mxu1 %vm748_vm6, %v488_v14 }
  0x25   : > { %1374 = vmatprep.mubr.msk.f32.mxu1 %vm1477_vm5, %v1476_v4 }
  0xed   : > { %v561_v18 = vpop.f32.mrb[0].mxu0  ;;  %v639_v19 = vpop.f32.mrb[0].mxu1 }
  0xee   : > { %v640_v21 = vadd.f32 %v639_v19, %v561_v18  ;;  %v1335_v22 = vpop.f32.mrb[1].mxu0  ;;  %v1340_v23 = vpop.f32.mrb[1].mxu1 }
  0xf0   : > { %v648_v24 = vadd.f32 %v1293_v20, %v640_v21 }
  0xf2   : > { %v650_v25 = vmin.f32 %v648_v24, 0.0  ;;  %vm649_vm8 = vcmp.gt.f32.partialorder %v648_v24, 0.0 }
  0xf4   : > { %v651_v26 = vmul.f32 0.5, %v650_v25 }
  0xf6   : > { %1428 = vtanh.f32 %v651_v26 }
  0xf7   : > { %v818_v28 = vpop.f32.mrb[2].mxu1 }
  0xf8   : > { %v819_v29 = vadd.f32 %v1296_v27, %v818_v28  ;;  %v1358_v30 = vpop.f32.mrb[3].mxu1 }
  0xfa   : > { %830 = vrot.lane.b32.xlu0 %v819_v29, %s1479_s30 }
 0x100   : > { %v1429_v31 = vpop.eup %1428 }
 0x101   : > { %v654_v32 = vsub.f32 1.0, %v1429_v31  ;;  %v653_v33 = vmul.f32 2.0, %v1429_v31 }
 0x103   : > { %1430 = vrcp.f32 %v654_v32 }
 0x10d   : > { %v1431_v34 = vpop.eup %1430 }
 0x10e   : > { %v656_v35 = vmul.f32 %v1431_v34, %v653_v33 }
 0x110   : > { %v657_v36 = vsel %vm649_vm8, %v648_v24, %v656_v35 }
 0x111   : > { %1346 = vmatmul.mubr.msk.f32.vlgmr.msra.gmra.mrb[2].mxu0 %vm665_vm7, %v657_v36 }
 0x112   : > { %1367 = vmatprep.mubr.msk.f32.mxu0 %vm1477_vm5, %v1476_v4  ;;  %v894_v4 = vld [vmem:[%s1728_s8 + $0x8] sm:$0xff] }
 0x113   : > { %v1387_v6 = vpack.c.bf16 %v894_v4, %v893_v3 }
 0x115   : > { %1388 = vmatpush3.bf16.msra.mxu0 %v1387_v6 }
 0x116   : > { %1389 = vmatprep.subr.bf16.mxu0 %v1478_v12  ;;  %v1301_v12 = vld [vmem:[%s1730_s10 + $0x5] ss:$0 sm:$0xff] }
 0x119   : > { %1391 = vmatpush3.bf16.msra.mxu0 %v1390_v8 }
 0x16c   : > { %v831_v45 = vpop.permute.xlu0 %830 }
 0x1e4   : > { %v735_v38 = vpop.f32.mrb[2].mxu0 }
 0x1e5   : > { %v736_v39 = vadd.f32 %v1294_v37, %v735_v38  ;;  %v1347_v40 = vpop.f32.mrb[3].mxu0  ;;  %v1012_v37 = vld [vmem:[%s1729_s9] sm:$0xff]  ;;  %v1013_v38 = vld [vmem:[%s1729_s9 + $0x8] sm:$0xff] }
 0x1e6   : > { %v486_v40 = vld [vmem:[%s459_s28] sm:$0xff] }
 0x1e7   : > { %v822_v41 = vadd.f32 %v819_v29, %v736_v39 }
 0x1e9   : > { %v1298_v42 = vmul.f32 -1.442695, %v822_v41 }
 0x1eb   : > { %1432 = vpow2.f32 %v1298_v42 }
 0x1f5   : > { %v1433_v43 = vpop.eup %1432 }
 0x1f6   : > { %v826_v44 = vadd.f32 1.0, %v1433_v43 }
 0x1f8   : > { %1434 = vrcp.f32 %v826_v44 }
 0x202   : > { %v1435_v46 = vpop.eup %1434 }
 0x203   : > { %v833_v47 = vmul.f32 %v1435_v46, %v831_v45  ;;  %v840_v52 = vsub.f32 1.0, %v1435_v46  ;;  %v1303_v45 = vld [vmem:[%s1730_s10 + $0x6] ss:$0 sm:$0xff] }
 0x205   : > { %835 = vrot.lane.b32.xlu0 %v833_v47, %s1479_s30  ;;  %v1304_v47 = vld [vmem:[%s1730_s10 + $0x7] ss:$0 sm:$0xff] }
 0x277   : > { %v836_v48 = vpop.permute.xlu0 %835 }
 0x278   : > { %v838_v49 = vadd.f32 %v836_v48, %v736_v39  ;;  %v1393_v39 = vpack.c.bf16 %v1013_v38, %v1012_v37 }
 0x27a   : > { %1436 = vtanh.f32 %v838_v49  ;;  %1394 = vmatpush3.bf16.msra.mxu1 %v1393_v39 }
 0x284   : > { %v1437_v50 = vpop.eup %1436 }
 0x285   : > { %842 = vrot.lane.b32.xlu1 %v1437_v50, %s1480_s14  ;;  %v1305_v50 = vld [vmem:[%s1730_s10 + $0x8] ss:$0 sm:$0xff] }
 0x289   : > { %846 = vrot.lane.b32.xlu1 %v488_v14, %s1481_s15 }
 0x2f7   : > { %v843_v51 = vpop.permute.xlu1 %842 }
 0x2f8   : > { %v845_v54 = vmul.f32 %v843_v51, %v840_v52 }
 0x2fb   : > { %v847_v53 = vpop.permute.xlu1 %846 }
 0x2fc   : > { %v849_v55 = vmul.f32 %v1435_v46, %v847_v53 }
 0x2fe   : > { %v850_v56 = vadd.f32 %v849_v55, %v845_v54 }
 0x300   : > { %854 = vrot.lane.b32.xlu0 %v850_v56, %s1480_s14 }
 0x372   : > { %v855_v57 = vpop.permute.xlu0 %854 }
 0x373   : > { %v857_v58 = vsel %vm748_vm6, %v855_v57, 0.0 }
 0x374   : > { %858 = vadd.xlane.f32.xlu1 %v857_v58 }
 0x385   : > { %880 = vrot.lane.b32.xlu1 %v1299_v59, %s1481_s15 }
 0x401   : > { %v859_v60 = vpop.xlane.xlu1 %858 }
 0x402   : > { %v861_v61 = vmul.f32 0.03125, %v859_v60 }
 0x404   : > { %v862_v62 = vsub.f32 %v850_v56, %v861_v61 }
 0x405   : > { %v881_v14 = vpop.permute.xlu1 %880 }
 0x406   : > { %v863_v63 = vmul.f32 %v862_v62, %v862_v62 }
 0x408   : > { %865 = vrot.lane.b32.xlu0 %v863_v63, %s1480_s14 }
 0x47a   : > { %v866_v0 = vpop.permute.xlu0 %865 }
 0x47b   : > { %v868_v1 = vsel %vm748_vm6, %v866_v0, 0.0 }
 0x47c   : > { %869 = vadd.xlane.f32.xlu0 %v868_v1 }
 0x492   : > { %889 = vrot.lane.b32.xlu0 %v1300_v2, %s1481_s15 }
 0x509   : > { %v870_v9 = vpop.xlane.xlu0 %869 }
 0x50a   : > { %v871_v10 = vmul.f32 0.03125, %v870_v9 }
 0x50c   : > { %v872_v11 = vadd.f32 1e-05, %v871_v10 }
 0x50d   : > { %v890_v16 = vpop.permute.xlu0 %889 }
 0x50e   : > { %1438 = vrsqrt.f32 %v872_v11 }
 0x518   : > { %v1439_v13 = vpop.eup %1438 }
 0x519   : > { %v874_v15 = vmul.f32 %v1439_v13, %v862_v62 }
 0x51b   : > { %v883_v17 = vmul.f32 %v881_v14, %v874_v15 }
 0x51d   : > { %v1662_v18 = vadd.f32 %v890_v16, %v883_v17 }
 0x51f   : > { %903 = vrot.lane.b32.xlu1 %v1662_v18, %s1480_s14 }
 0x591   : > { %v904_v19 = vpop.permute.xlu1 %903 }
 0x592   : > { %1145 = vst.msk [vmem:[#allocation3] sm:$0xff] %vm748_vm6, %v904_v19  ;;  %1368 = vmatmul.mubr.msk.f32.vlgmr.msra.gmra.mrb[4].mxu0 %vm748_vm6, %v904_v19  ;;  %v1307_v19 = vld [vmem:[%s1730_s10 + $0x9] ss:$0 sm:$0xff] }
 0x665   : > { %v973_v20 = vpop.f32.mrb[4].mxu0 }
 0x666   : > { %v974_v21 = vadd.f32 %v1301_v12, %v973_v20  ;;  %v1369_v22 = vpop.f32.mrb[5].mxu0 }
 0x668   : > { %v978_v23 = vmin.f32 %v974_v21, 0.0  ;;  %vm977_vm9 = vcmp.gt.f32.partialorder %v974_v21, 0.0 }
 0x66a   : > { %v979_v24 = vmul.f32 0.5, %v978_v23 }
 0x66c   : > { %1440 = vtanh.f32 %v979_v24 }
 0x676   : > { %v1441_v25 = vpop.eup %1440 }
 0x677   : > { %v982_v26 = vsub.f32 1.0, %v1441_v25  ;;  %v981_v27 = vmul.f32 2.0, %v1441_v25 }
 0x679   : > { %1442 = vrcp.f32 %v982_v26 }
 0x683   : > { %v1443_v28 = vpop.eup %1442 }
 0x684   : > { %v984_v29 = vmul.f32 %v1443_v28, %v981_v27 }
 0x686   : > { %v985_v30 = vsel %vm977_vm9, %v974_v21, %v984_v29 }
 0x687   : > { %v988_v31 = vsel %vm665_vm7, %v985_v30, 0.0 }
 0x688   : > { %989 = vadd.xlane.f32.xlu1 %v988_v31 }
 0x715   : > { %v990_v32 = vpop.xlane.xlu1 %989 }
 0x716   : > { %v992_v33 = vmul.f32 0.0625, %v990_v32 }
 0x718   : > { %v993_v34 = vsub.f32 %v985_v30, %v992_v33 }
 0x71a   : > { %v994_v35 = vmul.f32 %v993_v34, %v993_v34 }
 0x71c   : > { %v995_v36 = vsel %vm665_vm7, %v994_v35, 0.0 }
 0x71d   : > { %996 = vadd.xlane.f32.xlu0 %v995_v36 }
 0x733   : > { %1108 = vrot.lane.b32.xlu0 %v486_v40, %s1482_s29 }
 0x7aa   : > { %v997_v41 = vpop.xlane.xlu0 %996 }
 0x7ab   : > { %v998_v42 = vmul.f32 0.0625, %v997_v41 }
 0x7ad   : > { %v999_v43 = vadd.f32 1e-05, %v998_v42 }
 0x7ae   : > { %v1109_v1 = vpop.permute.xlu0 %1108 }
 0x7af   : > { %1444 = vrsqrt.f32 %v999_v43 }
 0x7b9   : > { %v1445_v44 = vpop.eup %1444 }
 0x7ba   : > { %v1001_v46 = vmul.f32 %v1445_v44, %v993_v34 }
 0x7bc   : > { %v1006_v48 = vmul.f32 %v1303_v45, %v1001_v46 }
 0x7be   : > { %v1011_v49 = vadd.f32 %v1304_v47, %v1006_v48 }
 0x7c0   : > { %1375 = vmatmul.mubr.msk.f32.vlgmr.msra.gmra.mrb[4].mxu1 %vm665_vm7, %v1011_v49 }
 0x893   : > { %v1088_v51 = vpop.f32.mrb[4].mxu1 }
 0x894   : > { %v1089_v52 = vadd.f32 %v1305_v50, %v1088_v51  ;;  %v1376_v53 = vpop.f32.mrb[5].mxu1 }
 0x896   : > { %v1093_v54 = vmin.f32 %v1089_v52, 20.0  ;;  %vm1092_vm11 = vcmp.gt.f32.partialorder %v1089_v52, 20.0 }
 0x898   : > { %v1094_v55 = vmul.f32 1.442695, %v1093_v54 }
 0x89a   : > { %1446 = vpow2.f32 %v1094_v55 }
 0x8a4   : > { %v1447_v56 = vpop.eup %1446 }
 0x8a5   : > { %v1096_v57 = vadd.f32 1.0, %v1447_v56  ;;  %v1099_v58 = vmul.f32 -0.5, %v1447_v56  ;;  %v1102_v60 = vand.u32 2147483647, %v1447_v56 }
 0x8a7   : > { %1448 = vlog2.f32 %v1096_v57  ;;  %v1100_v59 = vadd.f32 1.0, %v1099_v58  ;;  %vm1103_vm10 = vcmp.lt.f32.partialorder %v1102_v60, 0.0004427343 }
 0x8a9   : > { %v1101_v63 = vmul.f32 %v1447_v56, %v1100_v59 }
 0x8b1   : > { %v1449_v61 = vpop.eup %1448 }
 0x8b2   : > { %v1098_v62 = vmul.f32 0.6931472, %v1449_v61 }
 0x8b4   : > { %v1104_v0 = vsel %vm1103_vm10, %v1101_v63, %v1098_v62 }
 0x8b5   : > { %v1105_v2 = vsel %vm1092_vm11, %v1089_v52, %v1104_v0 }
 0x8b6   : > { %v1106_v3 = vadd.f32 0.1, %v1105_v2 }
 0x8b8   : > { %v1111_v4 = vmul.f32 %v1109_v1, %v1106_v3  ;;  %v1153_v22 = vsel %vm491_vm3, %v1089_v52, %v1106_v3 }
 0x8ba   : > { %1113 = vrot.lane.b32.xlu1 %v1111_v4, %s1483_s21 }
 0x92c   : > { %v1114_v5 = vpop.permute.xlu1 %1113 }
 0x92d   : > { %v1116_v6 = vadd.f32 %v1114_v5, %v1089_v52 }
 0x92f   : > { %v1119_v7 = vsel %vm491_vm3, %v1116_v6, 0.0 }
 0x930   : > { %1120 = vadd.xlane.f32.xlu1 %v1119_v7 }
 0x941   : > { %1150 = vrot.lane.b32.xlu1 %v1662_v18, %s1483_s21  ;;  %v1308_v18 = vld [vmem:[%s1730_s10 + $0xa] ss:$0 sm:$0xff] }
 0x9bd   : > { %v1121_v8 = vpop.xlane.xlu1 %1120 }
 0x9be   : > { %v1123_v9 = vmul.f32 0.125, %v1121_v8 }
 0x9c0   : > { %v1124_v10 = vsub.f32 %v1116_v6, %v1123_v9 }
 0x9c1   : > { %v1151_v24 = vpop.permute.xlu1 %1150 }
 0x9c2   : > { %v1125_v11 = vmul.f32 %v1124_v10, %v1124_v10 }
 0x9c4   : > { %v1126_v13 = vsel %vm491_vm3, %v1125_v11, 0.0 }
 0x9c5   : > { %1127 = vadd.xlane.f32.xlu0 %v1126_v13 }
 0xa52   : > { %v1128_v14 = vpop.xlane.xlu0 %1127 }
 0xa53   : > { %v1129_v15 = vmul.f32 0.125, %v1128_v14 }
 0xa55   : > { %v1130_v16 = vadd.f32 1e-05, %v1129_v15 }
 0xa57   : > { %1450 = vrsqrt.f32 %v1130_v16 }
 0xa61   : > { %v1451_v17 = vpop.eup %1450 }
 0xa62   : > { %v1132_v12 = vmul.f32 %v1451_v17, %v1124_v10 }
 0xa64   : > { %v1137_v20 = vmul.f32 %v1307_v19, %v1132_v12 }
 0xa66   : > { %v1142_v21 = vadd.f32 %v1308_v18, %v1137_v20 }
 0xa68   : > { %1147 = vrot.lane.b32.xlu0 %v1142_v21, %s1484_s26  ;;  %1143 = vst.msk [vmem:[#allocation2] sm:$0xff] %vm491_vm3, %v1142_v21 }
 0xada   : > { %v1148_v23 = vpop.permute.xlu0 %1147 }
 0xadb   : > { %v1154_v25 = vsel %vm665_vm7, %v1153_v22, %v1148_v23 }
 0xadc   : > { %v1156_v26 = vsel %vm1155_vm12, %v1154_v25, %v1151_v24 }
 0xadd   : > { %1158 = vst.msk [vmem:[%s474_s12] sm:$0xff] %vm1157_vm13, %v1156_v26 }
 0xade PF: > { %s21_s19 = sadd.s32 1, %s1474_s19   ;;  %s1732_s17 = smov %s1470_s18 }
 0xadf   : > { %p18_p6 = scmp.ge.s32.totalorder %s21_s19, 10   ;;  %s1733_s18 = smov %s1735_s20 }
 0xae1   :  { %20 = sbr.rel (!%p18_p6) target bundleno = 2 (0x2), region = 107 }

</bundles_post_ra>
